<compile_context>
chip_gen: v5e
topology: v5e:2x2
jax: 0.10.0
libtpu: 0.0.40
codegen_flags: <defaults>
</compile_context>

<pallas_src>
import functools
from types import SimpleNamespace

import numpy as np
import jax
import jax.numpy as jnp
from jax.experimental import pallas as pl
from jax.experimental.pallas import tpu as pltpu

_LANES = 128
_SUBLANES = 8


def _padded_rows(n_valid: int) -> int:
    rows = -(-n_valid // _LANES)                      # ceil(n / 128)
    rows = -(-rows // _SUBLANES) * _SUBLANES          # round up to sublane multiple
    return max(rows, _SUBLANES)


def _noise_factor(x, scale, n_valid):
    """std(x[:n_valid]) * scale, unbiased (N-1), single-pass.

    The padded tail of `x` is zero, so it contributes nothing to the sums;
    only the element count has to use n_valid."""
    n = float(n_valid)
    denom = float(n_valid - 1) if n_valid > 1 else 1.0
    s = jnp.sum(x)
    ss = jnp.sum(x * x)
    m = s / n
    var = (ss - n * m * m) / denom                    # torch.std default: unbiased
    var = jnp.maximum(var, 0.0)                       # guard fp cancellation
    return jnp.sqrt(var) * scale


def _rand_gauss_kernel(scale_ref, x_ref, noise_ref, o_ref, *, n_valid):
    """Fused std -> scale -> add.  noise_ref holds standard-normal draws."""
    x = x_ref[...]                                    # (rows, 128) f32, zero-padded
    nf = _noise_factor(x, scale_ref[0], n_valid)
    o_ref[...] = x + noise_ref[...] * nf


@functools.partial(jax.jit, static_argnames=("n_valid",))
def _apply_noise_2d(x2d, scale, key, *, n_valid):
    rows, lanes = x2d.shape
    noise = jax.random.normal(key, (rows, lanes), jnp.float32)
    scale_arr = jnp.reshape(scale.astype(jnp.float32), (1,))

    vmem = pl.BlockSpec(memory_space=pltpu.MemorySpace.VMEM)
    smem = pl.BlockSpec(memory_space=pltpu.MemorySpace.SMEM)

    return pl.pallas_call(
        functools.partial(_rand_gauss_kernel, n_valid=n_valid),
        out_shape=jax.ShapeDtypeStruct((rows, lanes), jnp.float32),
        in_specs=[smem, vmem, vmem],
        out_specs=vmem,
        input_output_aliases={1: 0},                  # emulate in-place `x += ...`
    )(scale_arr, x2d, noise)


def rand_gauss_apply(x, scale, seed):
    """Add N(0, (std(x)*scale)^2) gaussian noise to x via the Pallas kernel."""
    orig_shape, orig_dtype = x.shape, x.dtype
    flat = jnp.ravel(x).astype(jnp.float32)
    n_valid = int(flat.shape[0])
    rows = _padded_rows(n_valid)
    pad = rows * _LANES - n_valid
    x2d = jnp.pad(flat, (0, pad)).reshape(rows, _LANES)   # lane-dense, zero-padded
    key = jax.random.PRNGKey(int(seed))
    y2d = _apply_noise_2d(x2d, jnp.float32(scale), key, n_valid=n_valid)
    return y2d.reshape(-1)[:n_valid].reshape(orig_shape).astype(orig_dtype)


class RandGauss1D:
    """Pallas/JAX port of the PyTorch RandGauss1D transform."""

    def __init__(self, cfg, seed=0):
        if hasattr(cfg.RAND_GAUSS, "CHANCE"):
            self.chance = cfg.RAND_GAUSS.CHANCE
        elif hasattr(cfg, "CHANCE"):
            self.chance = cfg.CHANCE
        else:
            self.chance = 0.5
        self.intensity = 1.0
        if hasattr(cfg.RAND_GAUSS, "INTENSITY"):
            self.intensity = cfg.RAND_GAUSS.INTENSITY
        self.random_intensity = hasattr(cfg.RAND_GAUSS, "RAND")
        # Host-side RNG mirrors the module's np.random calls (seeded -> deterministic).
        self._rng = np.random.default_rng(seed)

    def __call__(self, x, lines=None, labels=None):
        if self._rng.uniform() < self.chance:
            scale = float(self.intensity)
            if self.random_intensity:
                scale *= float(self._rng.uniform())
            seed = int(self._rng.integers(0, 2**31 - 1))
            x = rand_gauss_apply(x, scale, seed)
        return (x, lines, labels)

    forward = __call__


if __name__ == "__main__":
    key = jax.random.PRNGKey(0)
    # (channel=1, time=2048) mono audio clip, matching the SSED-dim layout.
    x = jax.random.normal(key, (1, 2048), dtype=jnp.float32)

    cfg = SimpleNamespace(RAND_GAUSS=SimpleNamespace(CHANCE=1.0, INTENSITY=0.5, RAND=True))
    transform = RandGauss1D(cfg, seed=0)

    y, lines, labels = transform(x, lines=[(100.0, 900.0)], labels=None)
    y = jax.block_until_ready(y)

    assert y.shape == x.shape, y.shape
    assert bool(jnp.all(jnp.isfinite(y)))
    assert not bool(jnp.array_equal(y, x))   # chance=1.0 -> noise was actually added
    print("KERNEL_OK")
</pallas_src>

<mosaic_0001>
module attributes {stable_mosaic.version = 11 : i64} {
  func.func @_rand_gauss_kernel(%arg0: memref<1xf32, #tpu.memory_space<smem>>, %arg1: memref<16x128xf32, #tpu.memory_space<vmem>>, %arg2: memref<16x128xf32, #tpu.memory_space<vmem>>, %arg3: memref<16x128xf32, #tpu.memory_space<vmem>>) attributes {dimension_semantics = [], scalar_prefetch = 0 : i64, scratch_operands = 0 : i64, tpu.core_type = #tpu.core_type<tc>} {
    %c0 = arith.constant 0 : index
    %c0_0 = arith.constant 0 : index
    %0 = vector.load %arg1[%c0, %c0_0] : memref<16x128xf32, #tpu.memory_space<vmem>>, vector<16x128xf32>
    %c0_1 = arith.constant 0 : index
    %1 = memref.load %arg0[%c0_1] : memref<1xf32, #tpu.memory_space<smem>>
    %2 = vector.shape_cast %0 : vector<16x128xf32> to vector<1x16x128xf32>
    %cst = arith.constant dense<0.000000e+00> : vector<1xf32>
    %3 = vector.multi_reduction <add>, %2, %cst [1, 2] : vector<1x16x128xf32> to vector<1xf32>
    %4 = vector.shape_cast %3 : vector<1xf32> to vector<1x1x1xf32>
    %5 = vector.extract %4[0, 0, 0] : f32 from vector<1x1x1xf32>
    %6 = arith.mulf %0, %0 : vector<16x128xf32>
    %7 = vector.shape_cast %6 : vector<16x128xf32> to vector<1x16x128xf32>
    %cst_2 = arith.constant dense<0.000000e+00> : vector<1xf32>
    %8 = vector.multi_reduction <add>, %7, %cst_2 [1, 2] : vector<1x16x128xf32> to vector<1xf32>
    %9 = vector.shape_cast %8 : vector<1xf32> to vector<1x1x1xf32>
    %10 = vector.extract %9[0, 0, 0] : f32 from vector<1x1x1xf32>
    %cst_3 = arith.constant 2.048000e+03 : f32
    %11 = arith.divf %5, %cst_3 : f32
    %cst_4 = arith.constant 2.048000e+03 : f32
    %12 = arith.mulf %cst_4, %11 : f32
    %13 = arith.mulf %12, %11 : f32
    %14 = arith.subf %10, %13 : f32
    %cst_5 = arith.constant 2.047000e+03 : f32
    %15 = arith.divf %14, %cst_5 : f32
    %cst_6 = arith.constant 0.000000e+00 : f32
    %16 = arith.maximumf %15, %cst_6 : f32
    %17 = math.sqrt %16 : f32
    %18 = arith.mulf %17, %1 : f32
    %c0_7 = arith.constant 0 : index
    %c0_8 = arith.constant 0 : index
    %19 = vector.load %arg2[%c0_7, %c0_8] : memref<16x128xf32, #tpu.memory_space<vmem>>, vector<16x128xf32>
    %20 = vector.broadcast %18 : f32 to vector<16x128xf32>
    %21 = arith.mulf %19, %20 : vector<16x128xf32>
    %22 = arith.addf %0, %21 : vector<16x128xf32>
    %c0_9 = arith.constant 0 : index
    %c0_10 = arith.constant 0 : index
    %23 = vector.load %arg3[%c0_9, %c0_10] : memref<16x128xf32, #tpu.memory_space<vmem>>, vector<16x128xf32>
    tpu.vector_store %arg3[%c0_9, %c0_10], %22 {strides = array<i32>} : memref<16x128xf32, #tpu.memory_space<vmem>>, vector<16x128xf32>,
    return
  }
}

</mosaic_0001>

<bundles_post_ra>
// kernel: _apply_noise_2d.1
= control target key start
LH: loop header
LB: loop body
LE: loop exit
PB: predicated region body
PF: predicated region fallthrough
CT: control target
= control target key end

     0   :  { %9 = vsyncpa [#allocation4], 0  ;;  %s257_s0 = inlined_call_operand.<no memory space> [shape: f32[1], index: 0, kind: input, shape index: {}]   ;;  %s258_s1 = inlined_call_operand.hbm [shape: f32[16,128], index: 1, kind: input, shape index: {}, may-alias: {1,3}]   ;;  %s259_s2 = inlined_call_operand.vmem [shape: f32[16,128], index: 2, kind: input, shape index: {}]   ;;  %s260_s3 = inlined_call_operand.hbm [shape: f32[16,128], index: 3, kind: output, shape index: {}, may-alias: {1,3}]  }
   0x1   :  { %10 = vsyncpa [#allocation5], 0  ;;  %s17_s14 = sshll.u32 %s258_s1, 4  ;;  %s197_s15 = smov [#allocation3]   ;;  %s18_s14 = int_to_ptr.hbm [resolvable:$true] %s17_s14 }
   0x2   :  { %s19_s16 = sshll.u32 %s197_s15, 4  ;;  %s198_s17 = smov 128   ;;  %s20_s16 = int_to_ptr.vmem [resolvable:$true] %s19_s16 }
   0x3   :  { %s199_s18 = smov 8  }
   0x4   :  { %25 = dma.hbm_to_vmem [thread:$0]  %s18_s14, 256, %s20_s16, [#allocation4], %s198_s17, %s198_s17, %s199_s18  }
   0x5   :  { %193 = dma.done.wait [#allocation4], 256  }
   0x6   :  { %194 = vsyncadd [#allocation4], 4294967040  ;;  %v230_v0 = vld [vmem:[#allocation3] sm:$0xff]  ;;  %v232_v1 = vld [vmem:[#allocation3 + $0x8] sm:$0xff]  ;;  %v200_v6 = vmov 2048.0   ;;  %v201_v7 = vmov 2047.0  }
   0x7   :  { %v35_v2 = vadd.f32 %v232_v1, %v230_v0  ;;  %v45_v3 = vmul.f32 %v230_v0, %v230_v0  ;;  %v46_v4 = vmul.f32 %v232_v1, %v232_v1  ;;  %139 = vrcp.f32 %v200_v6  ;;  %s202_s27 = smov 0.0   ;;  %v94_v45 = vld [vmem:[%s259_s2] sm:$0xff]  ;;  %v95_v46 = vld [vmem:[%s259_s2 + $0x8] sm:$0xff]  ;;  %s203_s10 = smov [#allocation6]  }
   0x8   :  { %141 = vrcp.f32 %v201_v7  ;;  %s107_s11 = sshll.u32 %s203_s10, 4  ;;  %s109_s14 = sshll.u32 %s260_s3, 4  ;;  %s108_s11 = int_to_ptr.vmem [resolvable:$true] %s107_s11  ;;  %s110_s14 = int_to_ptr.hbm [resolvable:$true] %s109_s14 }
   0x9   :  { %36 = vadd.xlane.f32.xlu0 %v35_v2  ;;  %v47_v5 = vadd.f32 %v46_v4, %v45_v3 }
   0xd   :  { %v140_v8 = vpop.eup %139 }
   0xe   :  { %v142_v10 = vpop.eup %141  ;;  %v58_v13 = vmul.f32 2048.0, %v140_v8  ;;  %vm62_vm0 = vweird.f32 %v140_v8 }
   0xf   :  { %v70_v14 = vmul.f32 2047.0, %v142_v10  ;;  %vm74_vm1 = vweird.f32 %v142_v10 }
  0x10   :  { %v59_v17 = vsub.f32 1.0, %v58_v13 }
  0x11   :  { %48 = vadd.xlane.f32.xlu0 %v47_v5  ;;  %v71_v19 = vsub.f32 1.0, %v70_v14 }
  0x12   :  { %v60_v24 = vmul.f32 %v140_v8, %v59_v17 }
  0x13   :  { %v72_v25 = vmul.f32 %v142_v10, %v71_v19 }
  0x14   :  { %v61_v28 = vadd.f32 %v140_v8, %v60_v24 }
  0x15   :  { %v73_v29 = vadd.f32 %v142_v10, %v72_v25 }
  0x16   :  { %v63_v32 = vsel %vm62_vm0, %v140_v8, %v61_v28 }
  0x17   :  { %v75_v33 = vsel %vm74_vm1, %v142_v10, %v73_v29 }
  0x7c   :  { %v37_v9 = vpop.xlane.xlu0 %36 }
  0x7d   :  { %v38_v11 = vrot.slane %v37_v9, 4 }
  0x7f   :  { %v39_v12 = vadd.f32 %v38_v11, %v37_v9 }
  0x81   :  { %v40_v15 = vrot.slane %v39_v12, 2 }
  0x83   :  { %v41_v16 = vadd.f32 %v40_v15, %v39_v12 }
  0x84   :  { %v49_v18 = vpop.xlane.xlu0 %48 }
  0x85   :  { %v50_v20 = vrot.slane %v49_v18, 4  ;;  %v42_v21 = vrot.slane %v41_v16, 1 }
  0x87   :  { %v51_v22 = vadd.f32 %v50_v20, %v49_v18  ;;  %v43_v23 = vadd.f32 %v42_v21, %v41_v16 }
  0x89   :  { %v52_v26 = vrot.slane %v51_v22, 2  ;;  %122 = vpush %v43_v23 }
  0x8b   :  { %v53_v27 = vadd.f32 %v52_v26, %v51_v22 }
  0x8d   :  { %v54_v30 = vrot.slane %v53_v27, 1 }
  0x8f   :  { %v55_v31 = vadd.f32 %v54_v30, %v53_v27 }
  0x91   :  { %124 = vpush %v55_v31 }
  0x92   :  { %126 = vpush %v63_v32 }
  0x93   :  { %128 = vpush %v75_v33 }
  0xba   :  { %s123_s1 = spop %122 }
  0xc2   :  { %s125_s19 = spop %124 }
  0xc3   :  { %s127_s20 = spop %126 }
  0xc4   :  { %s65_s21 = smul.f32 %s127_s20, %s123_s1  ;;  %s129_s24 = spop %128 }
  0xc6   :  { %s66_s22 = smul.f32 2048.0, %s65_s21 }
  0xc8   :  { %s67_s23 = smul.f32 %s66_s22, %s65_s21 }
  0xca   :  { %s68_s25 = ssub.f32 %s125_s19, %s67_s23 }
  0xcc   :  { %s77_s26 = smul.f32 %s129_s24, %s68_s25 }
  0xce   :  { %s78_s28 = smax.f32 %s202_s27, %s77_s26 }
  0xcf   :  { %v79_v34 = vstv %s78_s28 }
  0xd0   :  { %143 = vrsqrt.f32 %v79_v34  ;;  %vm87_vm2 = vcmp.eq.f32.partialorder %v79_v34, inf  ;;  %v90_v42 = vand.u32 2147483648, %v79_v34  ;;  %vm89_vm3 = vcmp.eq.f32.partialorder %v79_v34, 0.0 }
  0xd6   :  { %v144_v35 = vpop.eup %143 }
  0xd7   :  { %v81_v36 = vmul.f32 %v144_v35, %v79_v34 }
  0xd9   :  { %v82_v37 = vmul.f32 %v144_v35, %v81_v36 }
  0xdb   :  { %v83_v38 = vmul.f32 0.5, %v82_v37 }
  0xdd   :  { %v84_v39 = vsub.f32 1.5, %v83_v38 }
  0xdf   :  { %v85_v40 = vmul.f32 %v144_v35, %v84_v39 }
  0xe1   :  { %v86_v41 = vmul.f32 %v85_v40, %v79_v34 }
  0xe3   :  { %v88_v43 = vsel %vm87_vm2, %v79_v34, %v86_v41 }
  0xe4   :  { %v91_v44 = vsel %vm89_vm3, %v90_v42, %v88_v43 }
  0xe5   :  { %130 = vpush %v91_v44 }
 0x116   :  { %s131_s29 = spop %130 }
 0x117   :  { %s93_s5 = smul.f32 %s131_s29, %s257_s0 }
 0x119   :  { %v96_v47 = vstv %s93_s5 }
 0x11a   :  { %v97_v48 = vmul.f32 %v96_v47, %v94_v45  ;;  %v98_v49 = vmul.f32 %v96_v47, %v95_v46 }
 0x11c   :  { %v99_v50 = vadd.f32 %v97_v48, %v230_v0  ;;  %v100_v51 = vadd.f32 %v98_v49, %v232_v1 }
 0x11e   :  { %101 = vst [vmem:[#allocation6] sm:$0xff] %v99_v50 }
 0x11f   :  { %102 = vst [vmem:[#allocation6 + $0x8] sm:$0xff] %v100_v51 }
 0x120   :  { %115 = dma.vmem_to_hbm [thread:$0]  %s108_s11, 256, %s110_s14, [#allocation5], %s198_s17, %s198_s17, %s199_s18  }
 0x121   :  { %195 = dma.done.wait [#allocation5], 256  }
 0x122   :  { %196 = vsyncadd [#allocation5], 4294967040 }
 0x123   :  { %120 = vsyncpa [#allocation4], 1 }
 0x124   :  { %121 = vsyncpa [#allocation5], 1 }

</bundles_post_ra>
